<compile_context>
chip_gen: v6e
topology: v6e:2x2x1
jax: 0.10.0
libtpu: 0.0.40
codegen_flags: <defaults>
</compile_context>

<pallas_src>
from functools import partial

import numpy as np
import jax
import jax.numpy as jnp
from jax import lax
from jax.experimental import pallas as pl
from jax.experimental.pallas import tpu as pltpu

LANE = 128    # TPU vreg lane width
CHUNK = 256   # in-kernel batch chunk: one N pass of the 256-wide MXU (2 passes on v5e)


def _round_up(a, m):
    return (a + m - 1) // m * m


def qinn_kernel(x_ref, w1_ref, b1_ref, w2_ref, b2_ref, w3c_ref, b3_ref, o_ref):
    """Fused forward pass, batch-on-lanes, chunked over 256-lane slices.

    x_ref   : (cpt, in_size, CHUNK)   input tile (cpt chunks of 256 batch rows)
    w1_ref  : (hid, in_size)          fc1 weight (PyTorch (out, in) layout)
    b1_ref  : (hid, 1)                fc1 bias
    w2_ref  : (hid, hid)              fc2 weight
    b2_ref  : (hid, 1)                fc2 bias
    w3c_ref : (hid, 1)                cosine-DFT matrix folded into fc3: C @ W3^T
    b3_ref  : (1, 1)                  fc3 bias
    o_ref   : (cpt, 1, CHUNK)         output tile (batch on lanes -> lane-dense store)
    """
    # Hoist weight/bias loads out of the chunk loop (constant across chunks).
    w1 = w1_ref[...]
    b1 = b1_ref[...]
    w2 = w2_ref[...]
    b2 = b2_ref[...]
    w3c = w3c_ref[...]
    b3 = b3_ref[...]

    n_chunks = x_ref.shape[0]

    def body(c, carry):
        xc = x_ref[c]                                              # (in, CHUNK)

        # fc1 + relu:  h1 = relu(W1 @ x_c + b1)   -> (hid, CHUNK), f32 accumulate
        h1 = jnp.dot(w1, xc, preferred_element_type=jnp.float32) + b1
        h1 = jnp.maximum(h1, 0.0)

        # fc2 + relu:  h2 = relu(W2 @ h1 + b2)    -> (hid, CHUNK), f32 accumulate
        h2 = jnp.dot(w2, h1.astype(w2.dtype),
                     preferred_element_type=jnp.float32) + b2
        h2 = jnp.maximum(h2, 0.0)

        # Quantum-inspired layer + fc3, folded:  y = w3c^T @ h2 + b3.
        # Single output row -> VPU broadcast-mul + XLU sublane reduce (no M=1 MXU op).
        y = jnp.sum(h2 * w3c, axis=0, keepdims=True) + b3          # (1, CHUNK), f32
        o_ref[c] = y.astype(o_ref.dtype)
        return carry

    lax.fori_loop(0, n_chunks, body, 0, unroll=True)


@partial(jax.jit, static_argnames=("batch_tile", "use_bf16"))
def qinn_forward(x, params, *, batch_tile=None, use_bf16=True):
    """Run the fused QINN forward pass through a single pallas_call.

    x: (B, input_size) float32.  Returns (B, output_size) float32.
    """
    B, in_size = x.shape
    hid, out_size = params["w3c"].shape
    assert out_size == 1, "kernel specialized to the module's output_size=1"

    # ---- Batch-tile selection -------------------------------------------------
    # Big tiles amortize the ~0.35us per-grid-step overhead; the in-kernel chunk
    # loop keeps vreg pressure flat, so only padding waste bounds the tile.
    # Keep >= 2 grid steps whenever B >= 512 so both v7x TensorCores get work.
    if batch_tile is None:
        TB_CAP = 2048
        b_al = _round_up(B, CHUNK)
        n_steps = -(-b_al // TB_CAP)
        if b_al >= 2 * CHUNK:
            n_steps = max(n_steps, 2)
        tb = _round_up(-(-b_al // n_steps), CHUNK)
    else:
        tb = batch_tile
    assert tb % CHUNK == 0, "batch tile must be a multiple of 256"
    B_pad = _round_up(B, tb)
    n_chunks = B_pad // CHUNK
    cpt = tb // CHUNK          # chunks per grid step
    grid = B_pad // tb

    # ---- Operand dtypes -------------------------------------------------------
    if use_bf16:
        # bf16 MXU operands, f32 accumulate (preferred_element_type in the kernel).
        w1, w2 = params["w1_lp"], params["w2_lp"]
        in_dtype = jnp.bfloat16
    else:
        w1, w2 = params["w1"], params["w2"]
        in_dtype = jnp.float32

    # ---- Input prep (single fused XLA op under jit): cast + pad + chunk + transpose.
    # Padded batch rows compute relu(b1)/relu(b2) garbage that is sliced off below;
    # this is intentional wasted work on at most tb-1 rows -- do NOT "fix" the slice.
    x_pad = jnp.pad(x.astype(in_dtype), ((0, B_pad - B), (0, 0)))      # (B_pad, in)
    x3 = jnp.swapaxes(x_pad.reshape(n_chunks, CHUNK, in_size), 1, 2)   # (n_chunks, in, CHUNK)

    def full(arr):
        # Constant block index -> pipeliner keeps the block resident, no per-step re-DMA.
        return pl.BlockSpec(arr.shape, lambda i: (0, 0))

    flops = 2 * B_pad * (in_size * hid + hid * hid + hid)
    bytes_accessed = int(
        x3.size * x3.dtype.itemsize
        + B_pad * 4
        + w1.size * w1.dtype.itemsize
        + w2.size * w2.dtype.itemsize
        + (hid * 3 + hid + 1) * 4
    )

    y3 = pl.pallas_call(
        qinn_kernel,
        out_shape=jax.ShapeDtypeStruct((n_chunks, 1, CHUNK), jnp.float32),
        grid_spec=pltpu.PrefetchScalarGridSpec(
            num_scalar_prefetch=0,
            grid=(grid,),
            in_specs=[
                pl.BlockSpec((cpt, in_size, CHUNK), lambda i: (i, 0, 0)),  # x chunks
                full(w1),
                full(params["b1"]),
                full(w2),
                full(params["b2"]),
                full(params["w3c"]),
                full(params["b3"]),
            ],
            out_specs=pl.BlockSpec((cpt, 1, CHUNK), lambda i: (i, 0, 0)),
        ),
        compiler_params=pltpu.CompilerParams(
            dimension_semantics=("parallel",),
        ),
        cost_estimate=pl.CostEstimate(
            flops=flops, transcendentals=0, bytes_accessed=bytes_accessed
        ),
    )(x3, w1, params["b1"], w2, params["b2"], params["w3c"], params["b3"])

    # (n_chunks, 1, CHUNK) flattens to batch order; drop padded rows.
    return y3.reshape(B_pad, out_size)[:B]


def init_params(key, input_size=7, hidden_size=64, output_size=1):
    """Deterministic init mimicking nn.Linear's U(-1/sqrt(fan_in), 1/sqrt(fan_in)).

    Weights are kept in PyTorch (out_features, in_features) layout (exactly what the
    transposed kernel wants).  The cosine-DFT matrix is folded into fc3 offline
    (w3c = C @ W3^T); bf16 copies of W1/W2 are precomputed once so the fast path
    does no per-call casts.  The unfolded w3/b3 are kept for the FFT reference.
    """
    ks = jax.random.split(key, 6)

    def linear(kw, kb, fan_in, fan_out):
        bound = 1.0 / np.sqrt(fan_in)
        w = jax.random.uniform(kw, (fan_out, fan_in), jnp.float32, -bound, bound)
        b = jax.random.uniform(kb, (fan_out,), jnp.float32, -bound, bound)
        return w, b

    w1, b1 = linear(ks[0], ks[1], input_size, hidden_size)
    w2, b2 = linear(ks[2], ks[3], hidden_size, hidden_size)
    w3, b3 = linear(ks[4], ks[5], hidden_size, output_size)

    # Cosine DFT matrix (symmetric): real(FFT(h))[k] = sum_n h[n] * cos(2*pi*n*k/N)
    n = np.arange(hidden_size)
    c = jnp.asarray(
        np.cos(2.0 * np.pi * np.outer(n, n) / hidden_size).astype(np.float32)
    )
    w3c = c @ w3.T                                   # (hid, out) == (64, 1)

    return {
        "w1": w1, "b1": b1.reshape(hidden_size, 1),
        "w2": w2, "b2": b2.reshape(hidden_size, 1),
        "w3c": w3c, "b3": b3.reshape(1, output_size),
        "w1_lp": w1.astype(jnp.bfloat16), "w2_lp": w2.astype(jnp.bfloat16),
        # unfolded params for the FFT-based reference:
        "w3": w3, "b3_vec": b3,
    }


def qinn_reference(x, params):
    """Pure-JAX reference matching the PyTorch forward exactly (uses real FFT)."""
    h1 = jnp.maximum(x @ params["w1"].T + params["b1"].T, 0.0)
    h2 = jnp.maximum(h1 @ params["w2"].T + params["b2"].T, 0.0)
    q = jnp.real(jnp.fft.fft(h2, axis=-1)).astype(jnp.float32)
    return q @ params["w3"].T + params["b3_vec"]


if __name__ == "__main__":
    key = jax.random.PRNGKey(0)
    k_param, k_x = jax.random.split(key)

    input_size, hidden_size, output_size = 7, 64, 1
    batch = 8

    params = init_params(k_param, input_size, hidden_size, output_size)
    x = jax.random.normal(k_x, (batch, input_size), jnp.float32)

    ref = jax.block_until_ready(qinn_reference(x, params))

    # Strict-parity path: f32 MXU operands must match the fp32 FFT reference tightly.
    out_f32 = jax.block_until_ready(qinn_forward(x, params, use_bf16=False))
    assert out_f32.shape == (batch, output_size)
    assert np.allclose(np.asarray(out_f32), np.asarray(ref), atol=1e-3, rtol=1e-3)

    # Default fast path: bf16 MXU operands, f32 accumulate.  Relaxed tolerance
    # (bf16 operand rounding through two layers), sanity-bounded against the
    # fp32 reference; strict correctness is established by the f32 path above.
    out_bf16 = jax.block_until_ready(qinn_forward(x, params))
    assert out_bf16.shape == (batch, output_size)
    assert np.allclose(np.asarray(out_bf16), np.asarray(ref), atol=1e-1, rtol=1e-1)

    print("KERNEL_OK")
</pallas_src>

<mosaic_0001>
module attributes {stable_mosaic.version = 11 : i64} {
  func.func @qinn_kernel(%arg0: i32, %arg1: memref<1x7x256xf32, #tpu.memory_space<vmem>>, %arg2: memref<64x7xf32, #tpu.memory_space<vmem>>, %arg3: memref<64x1xf32, #tpu.memory_space<vmem>>, %arg4: memref<64x64xf32, #tpu.memory_space<vmem>>, %arg5: memref<64x1xf32, #tpu.memory_space<vmem>>, %arg6: memref<64x1xf32, #tpu.memory_space<vmem>>, %arg7: memref<1x1xf32, #tpu.memory_space<vmem>>, %arg8: memref<1x1x256xf32, #tpu.memory_space<vmem>>) attributes {dimension_semantics = [#tpu.dimension_semantics<parallel>], iteration_bounds = array<i64: 1>, scalar_prefetch = 0 : i64, scratch_operands = 0 : i64, tpu.core_type = #tpu.core_type<tc>, window_params = [{transform_indices = @transform_0, window_bounds = array<i64: 1, 7, 256>}, {pipeline_mode = #tpu.pipeline_mode<synchronous>, transform_indices = @transform_1, window_bounds = array<i64: 64, 7>}, {pipeline_mode = #tpu.pipeline_mode<synchronous>, transform_indices = @transform_2, window_bounds = array<i64: 64, 1>}, {pipeline_mode = #tpu.pipeline_mode<synchronous>, transform_indices = @transform_3, window_bounds = array<i64: 64, 64>}, {pipeline_mode = #tpu.pipeline_mode<synchronous>, transform_indices = @transform_4, window_bounds = array<i64: 64, 1>}, {pipeline_mode = #tpu.pipeline_mode<synchronous>, transform_indices = @transform_5, window_bounds = array<i64: 64, 1>}, {pipeline_mode = #tpu.pipeline_mode<synchronous>, transform_indices = @transform_6, window_bounds = array<i64: 1, 1>}, {transform_indices = @transform_7, window_bounds = array<i64: 1, 1, 256>}]} {
    %c0 = arith.constant 0 : index
    %c0_0 = arith.constant 0 : index
    %0 = vector.load %arg2[%c0, %c0_0] : memref<64x7xf32, #tpu.memory_space<vmem>>, vector<64x7xf32>
    %c0_1 = arith.constant 0 : index
    %c0_2 = arith.constant 0 : index
    %1 = vector.load %arg3[%c0_1, %c0_2] : memref<64x1xf32, #tpu.memory_space<vmem>>, vector<64x1xf32>
    %c0_3 = arith.constant 0 : index
    %c0_4 = arith.constant 0 : index
    %2 = vector.load %arg4[%c0_3, %c0_4] : memref<64x64xf32, #tpu.memory_space<vmem>>, vector<64x64xf32>
    %c0_5 = arith.constant 0 : index
    %c0_6 = arith.constant 0 : index
    %3 = vector.load %arg5[%c0_5, %c0_6] : memref<64x1xf32, #tpu.memory_space<vmem>>, vector<64x1xf32>
    %c0_7 = arith.constant 0 : index
    %c0_8 = arith.constant 0 : index
    %4 = vector.load %arg6[%c0_7, %c0_8] : memref<64x1xf32, #tpu.memory_space<vmem>>, vector<64x1xf32>
    %c0_9 = arith.constant 0 : index
    %c0_10 = arith.constant 0 : index
    %5 = vector.load %arg7[%c0_9, %c0_10] : memref<1x1xf32, #tpu.memory_space<vmem>>, vector<1x1xf32>
    %c0_i32 = arith.constant 0 : i32
    %6 = arith.index_cast %c0_i32 : i32 to index
    %c0_11 = arith.constant 0 : index
    %c0_12 = arith.constant 0 : index
    %7 = vector.load %arg1[%6, %c0_11, %c0_12] : memref<1x7x256xf32, #tpu.memory_space<vmem>>, vector<1x7x256xf32>
    %8 = vector.shape_cast %7 : vector<1x7x256xf32> to vector<7x256xf32>
    %cst = arith.constant dense<0.000000e+00> : vector<64x256xf32>
    %9 = tpu.matmul %0, %8, %cst {dimension_numbers = #tpu.dot_dimension_numbers<[1], [0], [0], [1], [0, 0, 1, 1], [], []>} : vector<64x7xf32>, vector<7x256xf32>, vector<64x256xf32> -> vector<64x256xf32>
    %10 = vector.broadcast %1 : vector<64x1xf32> to vector<64x256xf32>
    %11 = arith.addf %9, %10 : vector<64x256xf32>
    %cst_13 = arith.constant 0.000000e+00 : f32
    %12 = vector.broadcast %cst_13 : f32 to vector<64x256xf32>
    %13 = arith.maximumf %11, %12 : vector<64x256xf32>
    %cst_14 = arith.constant dense<0.000000e+00> : vector<64x256xf32>
    %14 = tpu.matmul %2, %13, %cst_14 {dimension_numbers = #tpu.dot_dimension_numbers<[1], [0], [0], [1], [0, 0, 1, 1], [], []>} : vector<64x64xf32>, vector<64x256xf32>, vector<64x256xf32> -> vector<64x256xf32>
    %15 = vector.broadcast %3 : vector<64x1xf32> to vector<64x256xf32>
    %16 = arith.addf %14, %15 : vector<64x256xf32>
    %cst_15 = arith.constant 0.000000e+00 : f32
    %17 = vector.broadcast %cst_15 : f32 to vector<64x256xf32>
    %18 = arith.maximumf %16, %17 : vector<64x256xf32>
    %19 = vector.broadcast %4 : vector<64x1xf32> to vector<64x256xf32>
    %20 = arith.mulf %18, %19 : vector<64x256xf32>
    %cst_16 = arith.constant dense<0.000000e+00> : vector<256xf32>
    %21 = vector.multi_reduction <add>, %20, %cst_16 [0] : vector<64x256xf32> to vector<256xf32>
    %22 = vector.shape_cast %21 : vector<256xf32> to vector<1x256xf32>
    %23 = vector.broadcast %5 : vector<1x1xf32> to vector<1x256xf32>
    %24 = arith.addf %22, %23 : vector<1x256xf32>
    %25 = arith.index_cast %c0_i32 : i32 to index
    %c0_17 = arith.constant 0 : index
    %c0_18 = arith.constant 0 : index
    %26 = vector.load %arg8[%25, %c0_17, %c0_18] : memref<1x1x256xf32, #tpu.memory_space<vmem>>, vector<1x1x256xf32>
    %27 = vector.shape_cast %26 : vector<1x1x256xf32> to vector<1x256xf32>
    %28 = vector.shape_cast %24 : vector<1x256xf32> to vector<1x1x256xf32>
    tpu.vector_store %arg8[%25, %c0_17, %c0_18], %28 {strides = array<i32>} : memref<1x1x256xf32, #tpu.memory_space<vmem>>, vector<1x1x256xf32>,
    %c1_i32 = arith.constant 1 : i32
    return
  }
  func.func @transform_0(%arg0: i32) -> (i32, i32, i32) {
    %c0_i32 = arith.constant 0 : i32
    %c0_i32_0 = arith.constant 0 : i32
    %c0_i32_1 = arith.constant 0 : i32
    return %arg0, %c0_i32, %c0_i32_0 : i32, i32, i32
  }
  func.func @transform_1(%arg0: i32) -> (i32, i32) {
    %c0_i32 = arith.constant 0 : i32
    %c0_i32_0 = arith.constant 0 : i32
    %c0_i32_1 = arith.constant 0 : i32
    return %c0_i32, %c0_i32_0 : i32, i32
  }
  func.func @transform_2(%arg0: i32) -> (i32, i32) {
    %c0_i32 = arith.constant 0 : i32
    %c0_i32_0 = arith.constant 0 : i32
    %c0_i32_1 = arith.constant 0 : i32
    return %c0_i32, %c0_i32_0 : i32, i32
  }
  func.func @transform_3(%arg0: i32) -> (i32, i32) {
    %c0_i32 = arith.constant 0 : i32
    %c0_i32_0 = arith.constant 0 : i32
    %c0_i32_1 = arith.constant 0 : i32
    return %c0_i32, %c0_i32_0 : i32, i32
  }
  func.func @transform_4(%arg0: i32) -> (i32, i32) {
    %c0_i32 = arith.constant 0 : i32
    %c0_i32_0 = arith.constant 0 : i32
    %c0_i32_1 = arith.constant 0 : i32
    return %c0_i32, %c0_i32_0 : i32, i32
  }
  func.func @transform_5(%arg0: i32) -> (i32, i32) {
    %c0_i32 = arith.constant 0 : i32
    %c0_i32_0 = arith.constant 0 : i32
    %c0_i32_1 = arith.constant 0 : i32
    return %c0_i32, %c0_i32_0 : i32, i32
  }
  func.func @transform_6(%arg0: i32) -> (i32, i32) {
    %c0_i32 = arith.constant 0 : i32
    %c0_i32_0 = arith.constant 0 : i32
    %c0_i32_1 = arith.constant 0 : i32
    return %c0_i32, %c0_i32_0 : i32, i32
  }
  func.func @transform_7(%arg0: i32) -> (i32, i32, i32) {
    %c0_i32 = arith.constant 0 : i32
    %c0_i32_0 = arith.constant 0 : i32
    %c0_i32_1 = arith.constant 0 : i32
    return %arg0, %c0_i32, %c0_i32_0 : i32, i32, i32
  }
}

</mosaic_0001>

<bundles_post_ra>
// kernel: qinn_forward.1
= control target key start
LH: loop header
LB: loop body
LE: loop exit
PB: predicated region body
PF: predicated region fallthrough
CT: control target
= control target key end

     0   :  { %vm136_vm0 = vcmask 1046528   ;;  %v625_v2 = vmov 0.0   ;;  %vm111_vm1 = vcmask 56320   ;;  %v626_v4 = vmov 0   ;;  %s840_s0 = inlined_call_operand.vmem [shape: f32[1,7,256], index: 0, kind: input, shape index: {}]   ;;  %s841_s1 = inlined_call_operand.vmem [shape: f32[64,7], index: 1, kind: input, shape index: {}]   ;;  %s842_s6 = inlined_call_operand.<no memory space> [shape: f32[1,1], index: 6, kind: input, shape index: {}]   ;;  %s843_s2 = inlined_call_operand.vmem [shape: f32[64,1], index: 2, kind: input, shape index: {}]   ;;  %s844_s4 = inlined_call_operand.vmem [shape: f32[64,1], index: 4, kind: input, shape index: {}]   ;;  %s845_s5 = inlined_call_operand.vmem [shape: f32[64,1], index: 5, kind: input, shape index: {}]   ;;  %s846_s3 = inlined_call_operand.vmem [shape: f32[64,64], index: 3, kind: input, shape index: {}]   ;;  %s847_s7 = inlined_call_operand.vmem [shape: f32[1,1,256], index: 7, kind: output, shape index: {}]  }
   0x1   :  { %v70_v0 = vld [vmem:[%s840_s0 + $0x8] sm:$0x7f]  ;;  %v69_v1 = vld [vmem:[%s840_s0] sm:$0x7f]  ;;  %207 = vmatprep.mubr.f32.mxu0 %v625_v2  ;;  %623 = vset.pattern.permute.xlu0 %v626_v4  ;;  %v12_v5 = vstv %s842_s6  ;;  %v43_v6 = vld [vmem:[%s843_s2 + $0x38] sm:$0xff]  ;;  %vm312_vm2 = vcmask 523264  }
   0x2   :  { %v28_v3 = vld [vmem:[%s841_s1] sm:$0xff]  ;;  %586 = vmatprep.subr.msk.mxu0 %vm136_vm0, %v70_v0  ;;  %624 = vset.pattern.permute.xlu1 %v626_v4  ;;  %13 = vst [vmem:[#allocation2] sm:$0x1] %v12_v5  ;;  %v29_v7 = vld [vmem:[%s841_s1 + $0x8] sm:$0xff]  ;;  %v42_v9 = vld [vmem:[%s843_s2 + $0x30] sm:$0xff] }
   0x3   :  { %587 = vmatpush1.msk.msra.mxu0 %vm136_vm0, %v69_v1  ;;  %407 = vmatprep.mubr.f32.mxu1 %v625_v2  ;;  %v41_v8 = vld [vmem:[%s843_s2 + $0x28] sm:$0xff]  ;;  %v40_v10 = vld [vmem:[%s843_s2 + $0x20] sm:$0xff]  ;;  %v30_v11 = vld [vmem:[%s841_s1 + $0x10] sm:$0xff] }
   0x4   :  { %588 = vmatmul.mubr.msk.f32.vlgmr.msra.gmra.mxu0 %vm111_vm1, %v28_v3  ;;  %108 = vperm.xlu0 %623, %v43_v6   ;;  %v39_v12 = vld [vmem:[%s843_s2 + $0x18] sm:$0xff]  ;;  %v38_v13 = vld [vmem:[%s843_s2 + $0x10] sm:$0xff]  ;;  %v37_v15 = vld [vmem:[%s843_s2 + $0x8] sm:$0xff] }
   0x5   :  { %213 = vmatprep.mubr.f32.mxu0 %v625_v2  ;;  %98 = vperm.xlu1 %624, %v41_v8   ;;  %v31_v14 = vld [vmem:[%s841_s1 + $0x18] sm:$0xff]  ;;  %v36_v16 = vld [vmem:[%s843_s2] sm:$0xff]  ;;  %v53_v19 = vld [vmem:[%s844_s4 + $0x8] sm:$0xff] }
   0x6   :  { %v32_v17 = vld [vmem:[%s841_s1 + $0x20] sm:$0xff]  ;;  %v33_v20 = vld [vmem:[%s841_s1 + $0x28] sm:$0xff]  ;;  %v54_v21 = vld [vmem:[%s844_s4 + $0x10] sm:$0xff] }
   0x7   :  { %v52_v18 = vld [vmem:[%s844_s4] sm:$0xff]  ;;  %v55_v22 = vld [vmem:[%s844_s4 + $0x18] sm:$0xff]  ;;  %v34_v23 = vld [vmem:[%s841_s1 + $0x30] sm:$0xff] }
   0x8   :  { %589 = vmatmul.mubr.msk.f32.gmra.mxu0 %vm111_vm1, %v29_v7  ;;  %103 = vperm.xlu0 %623, %v42_v9   ;;  %v60_v24 = vld [vmem:[%s845_s5] sm:$0xff]  ;;  %v61_v25 = vld [vmem:[%s845_s5 + $0x8] sm:$0xff]  ;;  %v35_v26 = vld [vmem:[%s841_s1 + $0x38] sm:$0xff] }
   0x9   :  { %219 = vmatprep.mubr.f32.mxu0 %v625_v2  ;;  %93 = vperm.xlu1 %624, %v40_v10   ;;  %v56_v27 = vld [vmem:[%s844_s4 + $0x20] sm:$0xff]  ;;  %v62_v28 = vld [vmem:[%s845_s5 + $0x10] sm:$0xff]  ;;  %v57_v29 = vld [vmem:[%s844_s4 + $0x28] sm:$0xff] }
   0xa   :  { %v63_v30 = vld [vmem:[%s845_s5 + $0x18] sm:$0xff]  ;;  %v58_v31 = vld [vmem:[%s844_s4 + $0x30] sm:$0xff]  ;;  %v64_v32 = vld [vmem:[%s845_s5 + $0x20] sm:$0xff] }
   0xb   :  { %v59_v33 = vld [vmem:[%s844_s4 + $0x38] sm:$0xff]  ;;  %v65_v34 = vld [vmem:[%s845_s5 + $0x28] sm:$0xff]  ;;  %v66_v35 = vld [vmem:[%s845_s5 + $0x30] sm:$0xff] }
   0xc   :  { %590 = vmatmul.mubr.msk.f32.gmra.mxu0 %vm111_vm1, %v30_v11  ;;  %88 = vperm.xlu0 %623, %v39_v12   ;;  %v67_v36 = vld [vmem:[%s845_s5 + $0x38] sm:$0xff]  ;;  %v68_v37 = vld [vmem:[#allocation2] sm:$0x1] }
   0xd   :  { %225 = vmatprep.mubr.f32.mxu0 %v625_v2  ;;  %83 = vperm.xlu1 %624, %v38_v13  }
  0x10   :  { %591 = vmatmul.mubr.msk.f32.gmra.mxu0 %vm111_vm1, %v31_v14  ;;  %78 = vperm.xlu0 %623, %v37_v15  }
  0x11   :  { %231 = vmatprep.mubr.f32.mxu0 %v625_v2  ;;  %73 = vperm.xlu1 %624, %v36_v16  }
  0x14   :  { %592 = vmatmul.mubr.msk.f32.gmra.mxu0 %vm111_vm1, %v32_v17  ;;  %274 = vperm.xlu0 %623, %v52_v18  }
  0x15   :  { %237 = vmatprep.mubr.f32.mxu0 %v625_v2  ;;  %279 = vperm.xlu1 %624, %v53_v19  }
  0x18   :  { %593 = vmatmul.mubr.msk.f32.gmra.mxu0 %vm111_vm1, %v33_v20  ;;  %284 = vperm.xlu0 %623, %v54_v21  }
  0x19   :  { %243 = vmatprep.mubr.f32.mxu0 %v625_v2  ;;  %289 = vperm.xlu1 %624, %v55_v22  }
  0x1c   :  { %594 = vmatmul.mubr.msk.f32.gmra.mxu0 %vm111_vm1, %v34_v23  ;;  %468 = vperm.xlu0 %623, %v60_v24  }
  0x1d   :  { %249 = vmatprep.mubr.f32.mxu0 %v625_v2  ;;  %473 = vperm.xlu1 %624, %v61_v25  }
  0x20   :  { %595 = vmatmul.mubr.msk.f32.gmra.mxu0 %vm111_vm1, %v35_v26  ;;  %294 = vperm.xlu0 %623, %v56_v27  }
  0x21   :  { %401 = vmatprep.mubr.f32.mxu0 %v625_v2  ;;  %478 = vperm.xlu1 %624, %v62_v28  }
  0x24   :  { %299 = vperm.xlu0 %623, %v57_v29  }
  0x25   :  { %483 = vperm.xlu1 %624, %v63_v30  }
  0x28   :  { %304 = vperm.xlu0 %623, %v58_v31   ;;  %v44_v31 = vld [vmem:[%s846_s3] sm:$0xff] }
  0x29   :  { %488 = vperm.xlu1 %624, %v64_v32   ;;  %v45_v32 = vld [vmem:[%s846_s3 + $0x8] sm:$0xff] }
  0x2c   :  { %309 = vperm.xlu0 %623, %v59_v33   ;;  %v46_v33 = vld [vmem:[%s846_s3 + $0x10] sm:$0xff] }
  0x2d   :  { %493 = vperm.xlu1 %624, %v65_v34   ;;  %v47_v34 = vld [vmem:[%s846_s3 + $0x18] sm:$0xff] }
  0x30   :  { %498 = vperm.xlu0 %623, %v66_v35   ;;  %v48_v35 = vld [vmem:[%s846_s3 + $0x20] sm:$0xff] }
  0x31   :  { %503 = vperm.xlu1 %624, %v67_v36   ;;  %v49_v36 = vld [vmem:[%s846_s3 + $0x28] sm:$0xff] }
  0x34   :  { %550 = vperm.xlu0 %623, %v68_v37   ;;  %v50_v37 = vld [vmem:[%s846_s3 + $0x30] sm:$0xff] }
  0x7f   :  { %v109_v49 = vpop.permute.xlu0 %108 }
  0x80   :  { %v99_v51 = vpop.permute.xlu1 %98 }
  0x83   :  { %v104_v54 = vpop.permute.xlu0 %103 }
  0x84   :  { %v94_v56 = vpop.permute.xlu1 %93 }
  0x87   :  { %v89_v0 = vpop.permute.xlu0 %88 }
  0x88   :  { %v84_v4 = vpop.permute.xlu1 %83 }
  0x8b   :  { %v79_v15 = vpop.permute.xlu0 %78 }
  0x8c   :  { %v74_v18 = vpop.permute.xlu1 %73 }
  0xc4   :  { %v793_v38 = vpop.f32.mrf.mxu0 }
  0xc5   :  { %v210_v25 = vadd.f32 %v793_v38, %v74_v18  ;;  %v51_v38 = vld [vmem:[%s846_s3 + $0x38] sm:$0xff] }
  0xc6   :  { %v795_v39 = vpop.f32.mrf.mxu0 }
  0xc7   :  { %v212_v23 = vadd.f32 %v795_v39, %v74_v18  ;;  %v256_v30 = vmax.f32 %v210_v25, 0.0  ;;  %v275_v39 = vpop.permute.xlu0 %274 }
  0xc8   :  { %v215_v40 = vpop.f32.mrf.mxu0 }
  0xc9   :  { %v216_v21 = vadd.f32 %v215_v40, %v79_v15  ;;  %v257_v29 = vmax.f32 %v212_v23, 0.0  ;;  %v280_v40 = vpop.permute.xlu1 %279 }
  0xca   :  { %v217_v41 = vpop.f32.mrf.mxu0 }
  0xcb   :  { %v218_v19 = vadd.f32 %v217_v41, %v79_v15  ;;  %v258_v28 = vmax.f32 %v216_v21, 0.0  ;;  %v285_v41 = vpop.permute.xlu0 %284 }
  0xcc   :  { %v221_v42 = vpop.f32.mrf.mxu0 }
  0xcd   :  { %v222_v16 = vadd.f32 %v221_v42, %v84_v4  ;;  %v259_v27 = vmax.f32 %v218_v19, 0.0  ;;  %v290_v42 = vpop.permute.xlu1 %289 }
  0xce   :  { %v223_v43 = vpop.f32.mrf.mxu0 }
  0xcf   :  { %v224_v13 = vadd.f32 %v223_v43, %v84_v4  ;;  %v260_v26 = vmax.f32 %v222_v16, 0.0  ;;  %v469_v43 = vpop.permute.xlu0 %468 }
  0xd0   :  { %v227_v44 = vpop.f32.mrf.mxu0 }
  0xd1   :  { %v228_v11 = vadd.f32 %v227_v44, %v89_v0  ;;  %v261_v24 = vmax.f32 %v224_v13, 0.0  ;;  %v474_v44 = vpop.permute.xlu1 %473 }
  0xd2   :  { %v229_v45 = vpop.f32.mrf.mxu0 }
  0xd3   :  { %v230_v9 = vadd.f32 %v229_v45, %v89_v0  ;;  %v262_v22 = vmax.f32 %v228_v11, 0.0  ;;  %v295_v45 = vpop.permute.xlu0 %294 }
  0xd4   :  { %v233_v46 = vpop.f32.mrf.mxu0 }
  0xd5   :  { %v234_v7 = vadd.f32 %v233_v46, %v94_v56  ;;  %v263_v20 = vmax.f32 %v230_v9, 0.0 }
  0xd6   :  { %v235_v47 = vpop.f32.mrf.mxu0 }
  0xd7   :  { %v236_v5 = vadd.f32 %v235_v47, %v94_v56  ;;  %v264_v17 = vmax.f32 %v234_v7, 0.0 }
  0xd8   :  { %v239_v48 = vpop.f32.mrf.mxu0 }
  0xd9   :  { %v240_v1 = vadd.f32 %v239_v48, %v99_v51  ;;  %v265_v14 = vmax.f32 %v236_v5, 0.0 }
  0xda   :  { %v241_v50 = vpop.f32.mrf.mxu0 }
  0xdb   :  { %v242_v62 = vadd.f32 %v241_v50, %v99_v51  ;;  %v266_v12 = vmax.f32 %v240_v1, 0.0 }
  0xdc   :  { %v245_v52 = vpop.f32.mrf.mxu0 }
  0xdd   :  { %v246_v61 = vadd.f32 %v245_v52, %v104_v54  ;;  %v267_v10 = vmax.f32 %v242_v62, 0.0 }
  0xde   :  { %v247_v53 = vpop.f32.mrf.mxu0 }
  0xdf   :  { %v248_v59 = vadd.f32 %v247_v53, %v104_v54  ;;  %v268_v8 = vmax.f32 %v246_v61, 0.0 }
  0xe0   :  { %v251_v55 = vpop.f32.mrf.mxu0 }
  0xe1   :  { %v252_v57 = vadd.f32 %v251_v55, %v109_v49  ;;  %v269_v6 = vmax.f32 %v248_v59, 0.0 }
  0xe2   :  { %v253_v58 = vpop.f32.mrf.mxu0 }
  0xe3   :  { %v254_v60 = vadd.f32 %v253_v58, %v109_v49  ;;  %v270_v3 = vmax.f32 %v252_v57, 0.0  ;;  %v479_v49 = vpop.permute.xlu1 %478 }
  0xe5   :  { %v271_v63 = vmax.f32 %v254_v60, 0.0 }
  0xe7   :  { %353 = vmatprep.subr.mxu0 %v271_v63  ;;  %604 = vmatprep.subr.mxu1 %v271_v63  ;;  %v484_v59 = vpop.permute.xlu1 %483 }
  0xe8   :  { %354 = vmatpush1.msra.mxu0 %v270_v3  ;;  %612 = vmatpush1.msra.mxu1 %v270_v3 }
  0xe9   :  { %355 = vmatprep.subr.mxu0 %v269_v6  ;;  %605 = vmatprep.subr.mxu1 %v269_v6 }
  0xea   :  { %356 = vmatpush1.msra.mxu0 %v268_v8  ;;  %613 = vmatpush1.msra.mxu1 %v268_v8 }
  0xeb   :  { %357 = vmatprep.subr.mxu0 %v267_v10  ;;  %606 = vmatprep.subr.mxu1 %v267_v10  ;;  %v489_v16 = vpop.permute.xlu1 %488 }
  0xec   :  { %358 = vmatpush1.msra.mxu0 %v266_v12  ;;  %614 = vmatpush1.msra.mxu1 %v266_v12 }
  0xed   :  { %359 = vmatprep.subr.mxu0 %v265_v14  ;;  %607 = vmatprep.subr.mxu1 %v265_v14 }
  0xee   :  { %360 = vmatpush1.msra.mxu0 %v264_v17  ;;  %615 = vmatpush1.msra.mxu1 %v264_v17 }
  0xef   :  { %361 = vmatprep.subr.mxu0 %v263_v20  ;;  %608 = vmatprep.subr.mxu1 %v263_v20 }
  0xf0   :  { %362 = vmatpush1.msra.mxu0 %v262_v22  ;;  %616 = vmatpush1.msra.mxu1 %v262_v22 }
  0xf1   :  { %363 = vmatprep.subr.mxu0 %v261_v24  ;;  %609 = vmatprep.subr.mxu1 %v261_v24 }
  0xf2   :  { %364 = vmatpush1.msra.mxu0 %v260_v26  ;;  %617 = vmatpush1.msra.mxu1 %v260_v26 }
  0xf3   :  { %365 = vmatprep.subr.mxu0 %v259_v27  ;;  %610 = vmatprep.subr.mxu1 %v259_v27 }
  0xf4   :  { %366 = vmatpush1.msra.mxu0 %v258_v28  ;;  %618 = vmatpush1.msra.mxu1 %v258_v28 }
  0xf5   :  { %367 = vmatprep.subr.mxu0 %v257_v29  ;;  %611 = vmatprep.subr.mxu1 %v257_v29 }
  0xf6   :  { %368 = vmatpush1.msra.mxu0 %v256_v30  ;;  %619 = vmatpush1.msra.mxu1 %v256_v30 }
  0xf7   :  { %596 = vmatmul.mubr.msk.f32.vlgmr.msra.gmra.mxu0 %vm312_vm2, %v44_v31  ;;  %597 = vmatmul.mubr.msk.f32.vlgmr.msra.gmra.mxu1 %vm312_vm2, %v45_v32 }
  0xf8   :  { %413 = vmatprep.mubr.f32.mxu1 %v625_v2 }
  0xfb   :  { %598 = vmatmul.mubr.msk.f32.gmra.mxu1 %vm312_vm2, %v46_v33 }
  0xfc   :  { %419 = vmatprep.mubr.f32.mxu1 %v625_v2 }
  0xff   :  { %599 = vmatmul.mubr.msk.f32.gmra.mxu1 %vm312_vm2, %v47_v34 }
 0x100   :  { %425 = vmatprep.mubr.f32.mxu1 %v625_v2 }
 0x103   :  { %600 = vmatmul.mubr.msk.f32.gmra.mxu1 %vm312_vm2, %v48_v35 }
 0x104   :  { %431 = vmatprep.mubr.f32.mxu1 %v625_v2 }
 0x107   :  { %601 = vmatmul.mubr.msk.f32.gmra.mxu1 %vm312_vm2, %v49_v36 }
 0x108   :  { %437 = vmatprep.mubr.f32.mxu1 %v625_v2 }
 0x10b   :  { %602 = vmatmul.mubr.msk.f32.gmra.mxu1 %vm312_vm2, %v50_v37 }
 0x10c   :  { %443 = vmatprep.mubr.f32.mxu1 %v625_v2  ;;  %v300_v2 = vpop.permute.xlu0 %299 }
 0x10f   :  { %603 = vmatmul.mubr.msk.f32.gmra.mxu1 %vm312_vm2, %v51_v38  ;;  %v494_v38 = vpop.permute.xlu1 %493 }
 0x110   :  { %v305_v3 = vpop.permute.xlu0 %304 }
 0x114   :  { %v310_v23 = vpop.permute.xlu0 %309 }
 0x1b7   :  { %v403_v46 = vpop.f32.mrf.mxu0  ;;  %v409_v47 = vpop.f32.mrf.mxu1 }
 0x1b8   :  { %v404_v52 = vadd.f32 %v403_v46, %v275_v39  ;;  %v410_v53 = vadd.f32 %v409_v47, %v280_v40  ;;  %v499_v46 = vpop.permute.xlu0 %498 }
 0x1b9   :  { %v411_v48 = vpop.f32.mrf.mxu1  ;;  %v405_v50 = vpop.f32.mrf.mxu0 }
 0x1ba   :  { %v406_v55 = vadd.f32 %v405_v50, %v275_v39  ;;  %v412_v56 = vadd.f32 %v411_v48, %v280_v40  ;;  %v450_v60 = vmax.f32 %v404_v52, 0.0  ;;  %v452_v61 = vmax.f32 %v410_v53, 0.0 }
 0x1bb   :  { %v415_v51 = vpop.f32.mrf.mxu1 }
 0x1bc   :  { %v416_v57 = vadd.f32 %v415_v51, %v285_v41  ;;  %v451_v1 = vmax.f32 %v406_v55, 0.0  ;;  %v453_v4 = vmax.f32 %v412_v56, 0.0  ;;  %v506_v9 = vmul.f32 %v469_v43, %v450_v60 }
 0x1bd   :  { %v417_v54 = vpop.f32.mrf.mxu1  ;;  %v508_v10 = vmul.f32 %v474_v44, %v452_v61 }
 0x1be   :  { %v418_v62 = vadd.f32 %v417_v54, %v285_v41  ;;  %v454_v5 = vmax.f32 %v416_v57, 0.0  ;;  %v507_v14 = vmul.f32 %v469_v43, %v451_v1  ;;  %v509_v17 = vmul.f32 %v474_v44, %v453_v4 }
 0x1bf   :  { %v421_v58 = vpop.f32.mrf.mxu1  ;;  %v522_v24 = vadd.f32 %v508_v10, %v506_v9  ;;  %v553_v4 = vlaneseq }
 0x1c0   :  { %v422_v63 = vadd.f32 %v421_v58, %v290_v42  ;;  %v455_v11 = vmax.f32 %v418_v62, 0.0  ;;  %v510_v18 = vmul.f32 %v479_v49, %v454_v5  ;;  %v535_v31 = vadd.f32 %v509_v17, %v507_v14 }
 0x1c1   :  { %v423_v0 = vpop.f32.mrf.mxu1  ;;  %v554_v9 = vshrl.u32 %v553_v4, 7  ;;  %vm579_vm3 = vcmp.lt.s32.totalorder %v553_v4, 256 }
 0x1c2   :  { %v424_v6 = vadd.f32 %v423_v0, %v290_v42  ;;  %v456_v12 = vmax.f32 %v422_v63, 0.0  ;;  %v511_v25 = vmul.f32 %v479_v49, %v455_v11  ;;  %v523_v32 = vadd.f32 %v522_v24, %v510_v18 }
 0x1c3   :  { %v427_v7 = vpop.f32.mrf.mxu1 }
 0x1c4   :  { %v428_v8 = vadd.f32 %v427_v7, %v295_v45  ;;  %v457_v19 = vmax.f32 %v424_v6, 0.0  ;;  %v512_v26 = vmul.f32 %v484_v59, %v456_v12  ;;  %v536_v39 = vadd.f32 %v535_v31, %v511_v25 }
 0x1c5   :  { %v429_v13 = vpop.f32.mrf.mxu1  ;;  %v627_v12 = vmov 1966171168  }
 0x1c6   :  { %v430_v15 = vadd.f32 %v429_v13, %v295_v45  ;;  %v458_v20 = vmax.f32 %v428_v8, 0.0  ;;  %v513_v33 = vmul.f32 %v484_v59, %v457_v19  ;;  %v524_v40 = vadd.f32 %v523_v32, %v512_v26  ;;  %v504_v59 = vpop.permute.xlu1 %503  ;;  %v551_v19 = vpop.permute.xlu0 %550 }
 0x1c7   :  { %v433_v21 = vpop.f32.mrf.mxu1  ;;  %v563_v13 = vunpack.c.l.s4 %v627_v12 }
 0x1c8   :  { %v434_v22 = vadd.f32 %v433_v21, %v300_v2  ;;  %v459_v27 = vmax.f32 %v430_v15, 0.0  ;;  %v514_v34 = vmul.f32 %v489_v16, %v458_v20  ;;  %v537_v47 = vadd.f32 %v536_v39, %v513_v33 }
 0x1c9   :  { %v435_v28 = vpop.f32.mrf.mxu1  ;;  %v564_v20 = vunpack.c.0.s8 %v563_v13 }
 0x1ca   :  { %v460_v29 = vmax.f32 %v434_v22, 0.0  ;;  %v436_v30 = vadd.f32 %v435_v28, %v300_v2  ;;  %v515_v41 = vmul.f32 %v489_v16, %v459_v27  ;;  %v525_v48 = vadd.f32 %v524_v40, %v514_v34 }
 0x1cb   :  { %v439_v35 = vpop.f32.mrf.mxu1  ;;  %v555_v16 = vsub.s32 0, %v554_v9  ;;  %v567_v25 = vsub.s32 %v564_v20, %v554_v9 }
 0x1cc   :  { %v461_v36 = vmax.f32 %v436_v30, 0.0  ;;  %v440_v37 = vadd.f32 %v439_v35, %v305_v3  ;;  %v516_v43 = vmul.f32 %v494_v38, %v460_v29  ;;  %v538_v53 = vadd.f32 %v537_v47, %v515_v41 }
 0x1cd   :  { %v441_v42 = vpop.f32.mrf.mxu1 }
 0x1ce   :  { %v462_v44 = vmax.f32 %v440_v37, 0.0  ;;  %v442_v45 = vadd.f32 %v441_v42, %v305_v3  ;;  %v517_v50 = vmul.f32 %v494_v38, %v461_v36  ;;  %v526_v55 = vadd.f32 %v525_v48, %v516_v43 }
 0x1cf   :  { %v445_v49 = vpop.f32.mrf.mxu1 }
 0x1d0   :  { %v518_v51 = vmul.f32 %v499_v46, %v462_v44  ;;  %v463_v2 = vmax.f32 %v442_v45, 0.0  ;;  %v446_v52 = vadd.f32 %v445_v49, %v310_v23  ;;  %v539_v60 = vadd.f32 %v538_v53, %v517_v50 }
 0x1d1   :  { %v447_v54 = vpop.f32.mrf.mxu1 }
 0x1d2   :  { %v519_v56 = vmul.f32 %v499_v46, %v463_v2  ;;  %v464_v57 = vmax.f32 %v446_v52, 0.0  ;;  %v448_v58 = vadd.f32 %v447_v54, %v310_v23  ;;  %v527_v61 = vadd.f32 %v526_v55, %v518_v51 }
 0x1d3   :  { %v556_v23 = vrot.slane %v551_v19, %v555_v16 }
 0x1d4   :  { %v520_v62 = vmul.f32 %v504_v59, %v464_v57  ;;  %v465_v63 = vmax.f32 %v448_v58, 0.0  ;;  %v540_v0 = vadd.f32 %v539_v60, %v519_v56 }
 0x1d6   :  { %v528_v1 = vadd.f32 %v527_v61, %v520_v62  ;;  %v521_v3 = vmul.f32 %v504_v59, %v465_v63 }
 0x1d8   :  { %v529_v5 = vrot.slane %v528_v1, 4  ;;  %v541_v6 = vadd.f32 %v540_v0, %v521_v3 }
 0x1da   :  { %v530_v7 = vadd.f32 %v529_v5, %v528_v1  ;;  %v542_v8 = vrot.slane %v541_v6, 4 }
 0x1dc   :  { %v531_v10 = vrot.slane %v530_v7, 2  ;;  %v543_v11 = vadd.f32 %v542_v8, %v541_v6 }
 0x1de   :  { %v532_v14 = vadd.f32 %v531_v10, %v530_v7  ;;  %v544_v15 = vrot.slane %v543_v11, 2 }
 0x1e0   :  { %v533_v17 = vrot.slane %v532_v14, 1  ;;  %v545_v18 = vadd.f32 %v544_v15, %v543_v11 }
 0x1e2   :  { %v534_v21 = vadd.f32 %v533_v17, %v532_v14  ;;  %v546_v22 = vrot.slane %v545_v18, 1 }
 0x1e4   :  { %v547_v24 = vadd.f32 %v546_v22, %v545_v18  ;;  %v557_v26 = vadd.f32 %v556_v23, %v534_v21 }
 0x1e6   :  { %v558_v27 = vadd.f32 %v556_v23, %v547_v24 }
 0x1e8   :  { %v561_v28 = vcombine.low %v557_v26, %v558_v27 }
 0x1ea   :  { %v568_v29 = vrot.slane %v561_v28, %v567_v25 }
 0x1ec   :  { %v575_v30 = vrot.slane %v568_v29, %v567_v25 }
 0x1ee   :  { %581 = vst.msk [vmem:[%s847_s7] sm:$0x3] %vm579_vm3, %v575_v30 }

</bundles_post_ra>
